<compile_context>
chip_gen: v6e
topology: v6e:2x2x1
jax: 0.10.0
libtpu: 0.0.40
codegen_flags: <defaults>
</compile_context>

<pallas_src>
import functools

import jax
import jax.numpy as jnp
from jax.experimental import pallas as pl
from jax.experimental.pallas import tpu as pltpu

GEM_EPS = 1e-6


def _gem_kernel(p_ref, token_ref, mask_ref, out_ref, num_acc, den_acc, *,
                eps, seq_len, block_t, mask_time_tail, bf16_math):
    t = pl.program_id(2)

    @pl.when(t == 0)
    def _init():
        num_acc[...] = jnp.zeros_like(num_acc)
        den_acc[...] = jnp.zeros_like(den_acc)

    p = p_ref[0]                                          # learned scalar from SMEM

    x = token_ref[...]                                    # (bb, bt, bd)
    m = mask_ref[...].astype(jnp.float32)                 # (bb, bt, 1)

    if mask_time_tail:
        # Ragged last time block: the tail of the VMEM buffer holds stale data (possibly
        # NaN/Inf).  NaN * 0 == NaN, so the tail must be removed with a select, not a mul.
        t_idx = t * block_t + jax.lax.broadcasted_iota(jnp.int32, (1, block_t, 1), 1)
        valid = t_idx < seq_len
        m = jnp.where(valid, m, 0.0)
        x = jnp.where(valid, x, jnp.ones_like(x))

    if bf16_math and x.dtype == jnp.bfloat16:
        # bf16 EUP path (v6e/v7x only): halves log/exp cost; accumulate in f32.
        xc = jnp.maximum(x, jnp.asarray(eps, x.dtype))
        xp = jnp.exp(jnp.log(xc) * p.astype(x.dtype)).astype(jnp.float32)
    else:
        xc = jnp.maximum(x.astype(jnp.float32), eps)      # clamp(min=eps) -> x > 0
        xp = jnp.exp(jnp.log(xc) * p)                     # x ** p on the EUP

    num_acc[...] += jnp.sum(xp * m, axis=1)               # (bb, bd)
    den_acc[...] += jnp.sum(m, axis=1)                    # (bb, 1)

    @pl.when(t == pl.num_programs(2) - 1)
    def _finalize():
        # NOTE: fully-masked rows give 0/0 -> NaN, same as the PyTorch reference.
        mean = num_acc[...] / den_acc[...]
        out_ref[...] = jnp.exp(jnp.log(mean) * (1.0 / p)).astype(out_ref.dtype)


def _full_or_multiple(n, requested, quantum):
    """Tile size: the full dim if it fits in `requested`, else the largest multiple of
    `quantum` <= requested (ragged tails are handled by the kernel / dropped writes)."""
    if n <= requested:
        return n
    return max(quantum, (requested // quantum) * quantum)


def gem_forward(token, mask, p, *, eps=GEM_EPS, block_b=16, block_t=512,
                block_d=512, bf16_math=False):
    """token: (B, T, D); mask: (B, T) per-token mask (the PyTorch module receives it
    pre-broadcast to (B, T, D) — semantics identical); p: (1,) learned scalar.
    Returns (B, D) GeM-pooled features.  Set bf16_math=True for bf16 tokens on v6e/v7x."""
    B, T, D = token.shape
    assert mask.shape == (B, T), "pass the per-token mask un-broadcast as (B, T)"
    out_dtype = token.dtype
    tok_isize = jnp.dtype(token.dtype).itemsize
    out_isize = jnp.dtype(out_dtype).itemsize

    # ---- tile selection (no HBM padding / copies of the big tensor) ------------------
    bb = _full_or_multiple(B, block_b, 8)      # batch rows per block   (parallel axis)
    bd = _full_or_multiple(D, block_d, 128)    # feature lanes per block (parallel axis)
    bt = _full_or_multiple(T, block_t, 8)      # time steps per block    (reduction axis)

    # v7x has 2 TensorCores: try to expose >= 2 blocks on the parallel (B, D) axes.
    for _ in range(8):
        if pl.cdiv(B, bb) * pl.cdiv(D, bd) >= 2:
            break
        if bb > 8:
            bb = max(8, (bb // 2 + 7) // 8 * 8)
        elif bd > 128:
            bd = max(128, (bd // 2 + 127) // 128 * 128)
        else:
            break

    # Shrink tiles until the double-buffered working set fits this chip's VMEM.
    try:
        vmem_cap = int(pltpu.get_tpu_info().vmem_capacity_bytes)
    except Exception:
        vmem_cap = 64 << 20                    # v7x has the smallest VMEM -> safe fallback
    budget = int(0.60 * vmem_cap)

    def footprint(bb_, bt_, bd_):
        token_blk = bb_ * bt_ * bd_ * tok_isize
        mask_blk = bb_ * bt_ * 4
        out_blk = bb_ * bd_ * out_isize
        scratch = bb_ * bd_ * 4 + bb_ * 128 * 4
        return 2 * (token_blk + mask_blk) + 2 * out_blk + scratch

    for _ in range(32):
        if footprint(bb, bt, bd) <= budget:
            break
        if bt > 64:
            bt = max(64, (bt // 2 + 7) // 8 * 8)
        elif bd > 128:
            bd = max(128, (bd // 2 + 127) // 128 * 128)
        elif bb > 8:
            bb = max(8, (bb // 2 + 7) // 8 * 8)
        else:
            break

    grid = (pl.cdiv(B, bb), pl.cdiv(D, bd), pl.cdiv(T, bt))
    mask_time_tail = (T % bt) != 0

    # Mask stays narrow: (B, T, 1), not (B, T, D) -> D x less mask traffic than the
    # broadcast mask the PyTorch module consumes; broadcast happens for free in-kernel.
    msk = mask.astype(jnp.float32)[:, :, None]
    p_arr = jnp.asarray(p, jnp.float32).reshape((1,))

    vmem_limit = int(min(max(int(footprint(bb, bt, bd) * 1.2) + (2 << 20), 8 << 20),
                         int(0.9 * vmem_cap)))

    cost = pl.CostEstimate(
        flops=6 * B * T * D,
        transcendentals=2 * B * T * D,
        bytes_accessed=B * T * D * tok_isize + B * T * 4 + B * D * out_isize,
    )

    grid_spec = pltpu.PrefetchScalarGridSpec(
        num_scalar_prefetch=0,
        grid=grid,
        in_specs=[
            pl.BlockSpec(memory_space=pltpu.MemorySpace.SMEM),            # p (scalar)
            pl.BlockSpec((bb, bt, bd), lambda i, d, t: (i, t, d)),        # token block
            pl.BlockSpec((bb, bt, 1), lambda i, d, t: (i, t, 0)),         # mask block
        ],
        out_specs=pl.BlockSpec((bb, bd), lambda i, d, t: (i, d)),         # revisited over t
        scratch_shapes=[
            pltpu.VMEM((bb, bd), jnp.float32),   # numerator accumulator
            pltpu.VMEM((bb, 1), jnp.float32),    # denominator accumulator
        ],
    )

    kernel = functools.partial(
        _gem_kernel, eps=eps, seq_len=T, block_t=bt,
        mask_time_tail=mask_time_tail, bf16_math=bf16_math)

    return pl.pallas_call(
        kernel,
        out_shape=jax.ShapeDtypeStruct((B, D), out_dtype),
        grid_spec=grid_spec,
        compiler_params=pltpu.CompilerParams(
            dimension_semantics=("parallel", "parallel", "arbitrary"),
            vmem_limit_bytes=vmem_limit,
        ),
        cost_estimate=cost,
    )(p_arr, token, msk)


def gem_ref(token, mask, p, eps=GEM_EPS):
    """Pure-JAX reference with the exact semantics of the PyTorch module."""
    m = mask[:, :, None].astype(jnp.float32)
    x = jnp.maximum(token.astype(jnp.float32), eps) ** p
    num = jnp.sum(x * m, axis=1)
    den = jnp.sum(m, axis=1)
    return (num / den) ** (1.0 / p)


if __name__ == "__main__":
    key = jax.random.PRNGKey(0)
    k1, k2, k3, k4 = jax.random.split(key, 4)

    p = jnp.ones((1,), jnp.float32) * 3.0      # nn.Parameter(torch.ones(1) * 3)

    # --- case 1: small aligned f32, default tiles --------------------------------------
    B, T, D = 2, 8, 128
    token = jax.random.normal(k1, (B, T, D), jnp.float32)
    mask = (jax.random.uniform(k2, (B, T)) < 0.8).astype(jnp.float32)
    mask = mask.at[:, 0].set(1.0)              # guarantee a non-zero denominator per row
    out = jax.block_until_ready(gem_forward(token, mask, p))
    ref = gem_ref(token, mask, p[0])
    assert out.shape == (B, D)
    assert bool(jnp.all(jnp.isfinite(out)))
    assert bool(jnp.allclose(out, ref, rtol=1e-5, atol=1e-5)), "case 1: kernel != reference"

    # --- case 2: ragged T (in-kernel tail masking, no HBM padding) ---------------------
    B, T, D = 3, 13, 160
    token = jax.random.normal(k3, (B, T, D), jnp.float32)
    mask = (jax.random.uniform(k4, (B, T)) < 0.7).astype(jnp.float32)
    mask = mask.at[:, 0].set(1.0)
    out = jax.block_until_ready(gem_forward(token, mask, p, block_t=8))
    ref = gem_ref(token, mask, p[0])
    assert out.shape == (B, D)
    assert bool(jnp.all(jnp.isfinite(out)))
    assert bool(jnp.allclose(out, ref, rtol=1e-4, atol=1e-4)), "case 2: kernel != reference"

    # --- case 3: bf16 tokens on the wire (safe f32 in-kernel math) ---------------------
    # TODO(synk): flip bf16_math=True here once the target fleet is v6e/v7x-only (bf16 EUP).
    B, T, D = 2, 8, 256
    token = jax.random.normal(k1, (B, T, D), jnp.float32)
    mask = (jax.random.uniform(k2, (B, T)) < 0.8).astype(jnp.float32)
    mask = mask.at[:, 0].set(1.0)
    out = jax.block_until_ready(gem_forward(token.astype(jnp.bfloat16), mask, p))
    ref = gem_ref(token.astype(jnp.bfloat16), mask, p[0])
    assert out.shape == (B, D)
    assert bool(jnp.allclose(out.astype(jnp.float32), ref, rtol=2e-2, atol=2e-2)), \
        "case 3: kernel != reference"

    print("KERNEL_OK")
</pallas_src>

<mosaic_0001>
module attributes {stable_mosaic.version = 11 : i64} {
  func.func @_gem_kernel(%arg0: i32, %arg1: i32, %arg2: i32, %arg3: memref<1xf32, #tpu.memory_space<smem>>, %arg4: memref<2x8x128xf32, #tpu.memory_space<vmem>>, %arg5: memref<2x8x1xf32, #tpu.memory_space<vmem>>, %arg6: memref<2x128xf32, #tpu.memory_space<vmem>>, %arg7: memref<2x128xf32, #tpu.memory_space<vmem>>, %arg8: memref<2x1xf32, #tpu.memory_space<vmem>>) attributes {dimension_semantics = [#tpu.dimension_semantics<parallel>, #tpu.dimension_semantics<parallel>, #tpu.dimension_semantics<arbitrary>], iteration_bounds = array<i64: 1, 1, 1>, scalar_prefetch = 0 : i64, scratch_operands = 2 : i64, tpu.core_type = #tpu.core_type<tc>, window_params = [{transform_indices = @transform_0, window_bounds = array<i64: 1>}, {transform_indices = @transform_1, window_bounds = array<i64: 2, 8, 128>}, {transform_indices = @transform_2, window_bounds = array<i64: 2, 8, 1>}, {transform_indices = @transform_3, window_bounds = array<i64: 2, 128>}]} {
    %c0_i32 = arith.constant 0 : i32
    %0 = arith.cmpi eq, %arg2, %c0_i32 : i32
    %1 = arith.extui %0 : i1 to i32
    %c0_i32_0 = arith.constant 0 : i32
    %2 = arith.cmpi ne, %1, %c0_i32_0 : i32
    scf.if %2 {
      %cst_19 = arith.constant 0.000000e+00 : f32
      %25 = vector.broadcast %cst_19 : f32 to vector<2x128xf32>
      %c0_20 = arith.constant 0 : index
      %c0_21 = arith.constant 0 : index
      %26 = vector.load %arg7[%c0_20, %c0_21] : memref<2x128xf32, #tpu.memory_space<vmem>>, vector<2x128xf32>
      tpu.vector_store %arg7[%c0_20, %c0_21], %25 {strides = array<i32>} : memref<2x128xf32, #tpu.memory_space<vmem>>, vector<2x128xf32>,
      %cst_22 = arith.constant 0.000000e+00 : f32
      %27 = vector.broadcast %cst_22 : f32 to vector<2x1xf32>
      %c0_23 = arith.constant 0 : index
      %c0_24 = arith.constant 0 : index
      %28 = vector.load %arg8[%c0_23, %c0_24] : memref<2x1xf32, #tpu.memory_space<vmem>>, vector<2x1xf32>
      tpu.vector_store %arg8[%c0_23, %c0_24], %27 {strides = array<i32>} : memref<2x1xf32, #tpu.memory_space<vmem>>, vector<2x1xf32>,
    } else {
    }
    %c0 = arith.constant 0 : index
    %3 = memref.load %arg3[%c0] : memref<1xf32, #tpu.memory_space<smem>>
    %c0_1 = arith.constant 0 : index
    %c0_2 = arith.constant 0 : index
    %c0_3 = arith.constant 0 : index
    %4 = vector.load %arg4[%c0_1, %c0_2, %c0_3] : memref<2x8x128xf32, #tpu.memory_space<vmem>>, vector<2x8x128xf32>
    %c0_4 = arith.constant 0 : index
    %c0_5 = arith.constant 0 : index
    %c0_6 = arith.constant 0 : index
    %5 = vector.load %arg5[%c0_4, %c0_5, %c0_6] : memref<2x8x1xf32, #tpu.memory_space<vmem>>, vector<2x8x1xf32>
    %cst = arith.constant 9.99999997E-7 : f32
    %6 = vector.broadcast %cst : f32 to vector<2x8x128xf32>
    %7 = arith.maximumf %4, %6 : vector<2x8x128xf32>
    %8 = math.log %7 : vector<2x8x128xf32>
    %9 = vector.broadcast %3 : f32 to vector<2x8x128xf32>
    %10 = arith.mulf %8, %9 : vector<2x8x128xf32>
    %11 = math.exp %10 : vector<2x8x128xf32>
    %c0_7 = arith.constant 0 : index
    %c0_8 = arith.constant 0 : index
    %12 = vector.load %arg7[%c0_7, %c0_8] : memref<2x128xf32, #tpu.memory_space<vmem>>, vector<2x128xf32>
    %13 = vector.broadcast %5 : vector<2x8x1xf32> to vector<2x8x128xf32>
    %14 = arith.mulf %11, %13 : vector<2x8x128xf32>
    %cst_9 = arith.constant dense<0.000000e+00> : vector<2x128xf32>
    %15 = vector.multi_reduction <add>, %14, %cst_9 [1] : vector<2x8x128xf32> to vector<2x128xf32>
    %16 = arith.addf %12, %15 : vector<2x128xf32>
    %c0_10 = arith.constant 0 : index
    %c0_11 = arith.constant 0 : index
    %17 = vector.load %arg7[%c0_10, %c0_11] : memref<2x128xf32, #tpu.memory_space<vmem>>, vector<2x128xf32>
    tpu.vector_store %arg7[%c0_10, %c0_11], %16 {strides = array<i32>} : memref<2x128xf32, #tpu.memory_space<vmem>>, vector<2x128xf32>,
    %c0_12 = arith.constant 0 : index
    %c0_13 = arith.constant 0 : index
    %18 = vector.load %arg8[%c0_12, %c0_13] : memref<2x1xf32, #tpu.memory_space<vmem>>, vector<2x1xf32>
    %cst_14 = arith.constant dense<0.000000e+00> : vector<2x1xf32>
    %19 = vector.multi_reduction <add>, %5, %cst_14 [1] : vector<2x8x1xf32> to vector<2x1xf32>
    %20 = arith.addf %18, %19 : vector<2x1xf32>
    %c0_15 = arith.constant 0 : index
    %c0_16 = arith.constant 0 : index
    %21 = vector.load %arg8[%c0_15, %c0_16] : memref<2x1xf32, #tpu.memory_space<vmem>>, vector<2x1xf32>
    tpu.vector_store %arg8[%c0_15, %c0_16], %20 {strides = array<i32>} : memref<2x1xf32, #tpu.memory_space<vmem>>, vector<2x1xf32>,
    %c0_i32_17 = arith.constant 0 : i32
    %22 = arith.cmpi eq, %arg2, %c0_i32_17 : i32
    %23 = arith.extui %22 : i1 to i32
    %c0_i32_18 = arith.constant 0 : i32
    %24 = arith.cmpi ne, %23, %c0_i32_18 : i32
    scf.if %24 {
      %c0_19 = arith.constant 0 : index
      %c0_20 = arith.constant 0 : index
      %25 = vector.load %arg7[%c0_19, %c0_20] : memref<2x128xf32, #tpu.memory_space<vmem>>, vector<2x128xf32>
      %c0_21 = arith.constant 0 : index
      %c0_22 = arith.constant 0 : index
      %26 = vector.load %arg8[%c0_21, %c0_22] : memref<2x1xf32, #tpu.memory_space<vmem>>, vector<2x1xf32>
      %27 = vector.broadcast %26 : vector<2x1xf32> to vector<2x128xf32>
      %28 = arith.divf %25, %27 : vector<2x128xf32>
      %29 = math.log %28 : vector<2x128xf32>
      %cst_23 = arith.constant 1.000000e+00 : f32
      %30 = arith.divf %cst_23, %3 : f32
      %31 = vector.broadcast %30 : f32 to vector<2x128xf32>
      %32 = arith.mulf %29, %31 : vector<2x128xf32>
      %33 = math.exp %32 : vector<2x128xf32>
      %c0_24 = arith.constant 0 : index
      %c0_25 = arith.constant 0 : index
      %34 = vector.load %arg6[%c0_24, %c0_25] : memref<2x128xf32, #tpu.memory_space<vmem>>, vector<2x128xf32>
      tpu.vector_store %arg6[%c0_24, %c0_25], %33 {strides = array<i32>} : memref<2x128xf32, #tpu.memory_space<vmem>>, vector<2x128xf32>,
    } else {
    }
    return
  }
  func.func @transform_0(%arg0: i32, %arg1: i32, %arg2: i32) -> i32 {
    %c0_i32 = arith.constant 0 : i32
    %c0_i32_0 = arith.constant 0 : i32
    return %c0_i32 : i32
  }
  func.func @transform_1(%arg0: i32, %arg1: i32, %arg2: i32) -> (i32, i32, i32) {
    %c0_i32 = arith.constant 0 : i32
    return %arg0, %arg2, %arg1 : i32, i32, i32
  }
  func.func @transform_2(%arg0: i32, %arg1: i32, %arg2: i32) -> (i32, i32, i32) {
    %c0_i32 = arith.constant 0 : i32
    %c0_i32_0 = arith.constant 0 : i32
    return %arg0, %arg2, %c0_i32 : i32, i32, i32
  }
  func.func @transform_3(%arg0: i32, %arg1: i32, %arg2: i32) -> (i32, i32) {
    %c0_i32 = arith.constant 0 : i32
    return %arg0, %arg1 : i32, i32
  }
}

</mosaic_0001>

<bundles_post_ra>
// kernel: tpu_custom_call.1
= control target key start
LH: loop header
LB: loop body
LE: loop exit
PB: predicated region body
PF: predicated region fallthrough
CT: control target
= control target key end

     0   :  { %vm74_vm0 = vcmask 7168   ;;  %v177_v2 = vmov 0   ;;  %vm21_vm1 = vcmask 1024   ;;  %v178_v5 = vmov 0.0   ;;  %s222_s0 = inlined_call_operand.<no memory space> [shape: f32[1], index: 0, kind: input, shape index: {}]   ;;  %s223_s1 = inlined_call_operand.vmem [shape: f32[2,8,128], index: 1, kind: input, shape index: {}]   ;;  %s224_s2 = inlined_call_operand.vmem [shape: f32[2,8,1], index: 2, kind: input, shape index: {}]   ;;  %s225_s3 = inlined_call_operand.hbm [shape: f32[2,128], index: 3, kind: output, shape index: {}]  }
   0x1   :  { %v26_v0 = vld [vmem:[%s224_s2] sm:$0xff]  ;;  %v27_v1 = vld [vmem:[%s224_s2 + $0x8] sm:$0xff]  ;;  %137 = vset.pattern.permute.xlu0 %v177_v2  ;;  %20 = vst [vmem:[#allocation2] sm:$0x3] %v178_v5  ;;  %138 = vset.pattern.permute.xlu1 %v177_v2  ;;  %22 = vst.msk [vmem:[#allocation3] sm:$0x3] %vm21_vm1, %v178_v5  ;;  %v34_v8 = vstv %s222_s0 }
   0x2   :  { %v75_v3 = vsel %vm74_vm0, %v26_v0, 0.0  ;;  %v82_v4 = vsel %vm74_vm0, %v27_v1, 0.0  ;;  %44 = vperm.xlu0 %137, %v26_v0   ;;  %139 = vrcp.f32 %v34_v8 }
   0x3   :  { %v76_v6 = vrot.slane %v75_v3, 4  ;;  %v83_v7 = vrot.slane %v82_v4, 4 }
   0x4   :  { %9 = vsyncpa [#allocation6], 0  ;;  %vm68_vm2 = vcmask 1041409   ;;  %v24_v24 = vld [vmem:[%s223_s1] sm:$0xff]  ;;  %v25_v26 = vld [vmem:[%s223_s1 + $0x8] sm:$0xff]  ;;  %s179_s20 = smov [#allocation5]  }
   0x5   :  { %v77_v9 = vadd.f32 %v76_v6, %v75_v3  ;;  %v84_v10 = vadd.f32 %v83_v7, %v82_v4  ;;  %v28_v25 = vmax.f32 %v24_v24, 1e-06  ;;  %v29_v27 = vmax.f32 %v25_v26, 1e-06  ;;  %s124_s21 = sshll.u32 %s179_s20, 4  ;;  %s125_s21 = int_to_ptr.vmem [resolvable:$true] %s124_s21 }
   0x6   :  { %49 = vperm.xlu0 %137, %v27_v1   ;;  %s155_s22 = scalar_lea.vmem %s125_s21, 32  ;;  %p160_p1 = scmp.lt.s32.totalorder %s125_s21, %s125_s21 }
   0x7   :  { %v78_v11 = vrot.slane %v77_v9, 2  ;;  %v85_v12 = vrot.slane %v84_v10, 2  ;;  %141 = vlog2.f32 %v28_v25  ;;  %p156_p0 = scmp.ne.s32.totalorder %s125_s21, %s155_s22  ;;  %p161_p2 = scmp.lt.s32.totalorder %s155_s22, %s155_s22 }
   0x8   :  { %v73_v19 = vld [vmem:[#allocation3] sm:$0x3]  ;;  %143 = vlog2.f32 %v29_v27  ;;  %v41_v53 = vld [vmem:[#allocation2] sm:$0x3] }
   0x9   :  { %v79_v13 = vadd.f32 %v78_v11, %v77_v9  ;;  %v86_v14 = vadd.f32 %v85_v12, %v84_v10  ;;  %p162_p3 = por %p161_p2, %p160_p1 }
   0xb   :  { %v80_v15 = vrot.slane %v79_v13, 1  ;;  %v87_v16 = vrot.slane %v86_v14, 1  ;;  %p163_p4 = pnand %p162_p3, %p156_p0 }
   0xd   :  { %v81_v17 = vadd.f32 %v80_v15, %v79_v13  ;;  %v88_v18 = vadd.f32 %v87_v16, %v86_v14 }
   0xf   :  { %v91_v20 = vsel %vm68_vm2, %v88_v18, %v81_v17  ;;  %v140_v22 = vpop.eup %139 }
  0x10   :  { %v93_v21 = vadd.f32 %v91_v20, %v73_v19  ;;  %132 = vpush %v140_v22 }
  0x12   :  { %95 = vst.msk [vmem:[#allocation3] sm:$0x3] %vm21_vm1, %v93_v21 }
  0x14   :  { %v142_v28 = vpop.eup %141 }
  0x15   :  { %v31_v29 = vmul.f32 0.6931472, %v142_v28  ;;  %v144_v30 = vpop.eup %143 }
  0x16   :  { %v33_v32 = vmul.f32 0.6931472, %v144_v30 }
  0x17   :  { %v35_v31 = vmul.f32 %v34_v8, %v31_v29 }
  0x18   :  { %v36_v34 = vmul.f32 %v34_v8, %v33_v32 }
  0x19   :  { %v100_v23 = vld [vmem:[#allocation3] sm:$0x3]  ;;  %v37_v33 = vmul.f32 1.442695, %v35_v31 }
  0x1a   :  { %103 = vperm.xlu1 %138, %v100_v23   ;;  %v39_v35 = vmul.f32 1.442695, %v36_v34 }
  0x1b   :  { %145 = vpow2.f32 %v37_v33 }
  0x1c   :  { %147 = vpow2.f32 %v39_v35 }
  0x28   :  { %v146_v36 = vpop.eup %145 }
  0x29   :  { %v148_v39 = vpop.eup %147 }
  0x41   :  { %s133_s1 = spop %132 }
  0x42   :  { %v113_v62 = vstv %s133_s1 }
  0x7d   :  { %v45_v37 = vpop.permute.xlu0 %44 }
  0x7e   :  { %v52_v38 = vmul.f32 %v146_v36, %v45_v37 }
  0x80   :  { %v54_v40 = vrot.slane %v52_v38, 4 }
  0x81   :  { %v50_v41 = vpop.permute.xlu0 %49 }
  0x82   :  { %v55_v42 = vadd.f32 %v54_v40, %v52_v38  ;;  %v53_v43 = vmul.f32 %v148_v39, %v50_v41 }
  0x84   :  { %v56_v44 = vrot.slane %v55_v42, 2  ;;  %v60_v45 = vrot.slane %v53_v43, 4 }
  0x86   :  { %v57_v46 = vadd.f32 %v56_v44, %v55_v42  ;;  %v61_v47 = vadd.f32 %v60_v45, %v53_v43 }
  0x88   :  { %v62_v48 = vrot.slane %v61_v47, 2  ;;  %v58_v49 = vrot.slane %v57_v46, 1 }
  0x8a   :  { %v63_v50 = vadd.f32 %v62_v48, %v61_v47  ;;  %v59_v52 = vadd.f32 %v58_v49, %v57_v46 }
  0x8c   :  { %v64_v51 = vrot.slane %v63_v50, 1 }
  0x8e   :  { %v65_v54 = vadd.f32 %v64_v51, %v63_v50 }
  0x90   :  { %v69_v55 = vsel %vm68_vm2, %v65_v54, %v59_v52 }
  0x91   :  { %v71_v56 = vadd.f32 %v69_v55, %v41_v53 }
  0x93   :  { %72 = vst [vmem:[#allocation2] sm:$0x3] %v71_v56 }
  0x95   :  { %v104_v57 = vpop.permute.xlu1 %103 }
  0x96   :  { %149 = vrcp.f32 %v104_v57 }
  0x9a   :  { %v99_v59 = vld [vmem:[#allocation2] sm:$0x3] }
  0xa3   :  { %v150_v58 = vpop.eup %149 }
  0xa4   :  { %v107_v60 = vmul.f32 %v150_v58, %v99_v59 }
  0xa6   :  { %151 = vlog2.f32 %v107_v60 }
  0xb3   :  { %v152_v61 = vpop.eup %151 }
  0xb4   :  { %v109_v63 = vmul.f32 0.6931472, %v152_v61 }
  0xb6   :  { %v114_v0 = vmul.f32 %v113_v62, %v109_v63 }
  0xb8   :  { %v115_v1 = vmul.f32 1.442695, %v114_v0 }
  0xba   :  { %153 = vpow2.f32 %v115_v1 }
  0xc7   :  { %v154_v2 = vpop.eup %153 }
  0xc8   :  { %117 = vst [vmem:[#allocation5] sm:$0x3] %v154_v2 }
  0xc9   :  { %166 = shalt.err (!%p163_p4)
}
  0xca   :  { %127 = dma.vmem_to_hbm [thread:$0]  %s125_s21, 32, %s225_s3, [#allocation6]  }
  0xcb   :  { %175 = dma.done.wait [#allocation6], 32  }
  0xcc   :  { %176 = vsyncadd [#allocation6], 4294967264 }
  0xcd   :  { %131 = vsyncpa [#allocation6], 1 }

</bundles_post_ra>
